<compile_context>
chip_gen: v6e
topology: v6e:2x2x1
jax: 0.10.0
libtpu: 0.0.40
codegen_flags: <defaults>
</compile_context>

<pallas_src>
import numpy as np
import jax
import jax.numpy as jnp
from jax.experimental import pallas as pl
from jax.experimental.pallas import tpu as pltpu


_LANE = 128
_SUBLANE = 8
_TARGET_BLOCK_BYTES = 2 * 1024 * 1024   # ~2 MiB/block: safe on v5e/v6e/v7x


def _copy_kernel(x_ref, o_ref):
    # Pure data movement: one lane/sublane-dense tile per grid step.
    o_ref[...] = x_ref[...]


def _identity_copy_flat(x_flat: jax.Array) -> jax.Array:
    """Pallas HBM->HBM copy of a 1-D array using large lane-dense 2-D tiles."""
    N = int(x_flat.shape[0])
    itemsize = np.dtype(x_flat.dtype).itemsize

    # Pick the widest lane-dense column count (multiple of 128) dividing N.
    cols = None
    for c in (1024, 512, 256, 128):
        if N % c == 0:
            cols = c
            break

    if cols is None:
        # TODO(synk): ragged N (not a multiple of 128) falls back to a single
        # full-extent block (masked stores); pad or split main/tail for large N.
        x2 = x_flat.reshape(1, N)
        out = pl.pallas_call(
            _copy_kernel,
            out_shape=jax.ShapeDtypeStruct((1, N), x_flat.dtype),
            input_output_aliases={0: 0},
        )(x2)
        return out.reshape(N)

    rows = N // cols
    if rows <= _SUBLANE:
        # Full first-dim extent is always a legal block shape.
        block_rows = rows
    else:
        target_rows = max(_SUBLANE, _TARGET_BLOCK_BYTES // (cols * itemsize))
        block_rows = min(rows, (target_rows // _SUBLANE) * _SUBLANE)

    grid = (pl.cdiv(rows, block_rows),)
    x2 = x_flat.reshape(rows, cols)
    out = pl.pallas_call(
        _copy_kernel,
        out_shape=jax.ShapeDtypeStruct((rows, cols), x_flat.dtype),
        grid=grid,
        in_specs=[pl.BlockSpec((block_rows, cols), lambda i: (i, 0))],
        out_specs=pl.BlockSpec((block_rows, cols), lambda i: (i, 0)),
        input_output_aliases={0: 0},
        compiler_params=pltpu.CompilerParams(
            dimension_semantics=("parallel",)),
    )(x2)
    return out.reshape(N)


class InversibleFlatten:
    """JAX/Pallas port of the PyTorch InversibleFlatten module."""

    def __init__(self, input_shape, inverse: bool = False):
        self.input_shape = tuple(int(s) for s in input_shape)
        self._inverse = inverse

    @property
    def inverse(self) -> "InversibleFlatten":
        return InversibleFlatten(input_shape=self.input_shape,
                                 inverse=not self._inverse)

    def __call__(self, x: jax.Array) -> jax.Array:
        if self._inverse:
            assert x.ndim == 2
            B = x.shape[0]
            y = _identity_copy_flat(x.reshape(-1))        # Pallas hot path
            return y.reshape((B, *self.input_shape))      # metadata-only glue
        B = x.shape[0]
        D = int(np.prod(x.shape[1:]))
        y = _identity_copy_flat(x.reshape(-1))            # Pallas hot path
        return y.reshape(B, D)                            # metadata-only glue


if __name__ == "__main__":
    # Small deterministic input consistent with the module's NCHW usage.
    key = jax.random.PRNGKey(0)
    B, C, H, W = 2, 4, 16, 16
    x = jax.random.normal(key, (B, C, H, W), dtype=jnp.float32)

    module = InversibleFlatten(input_shape=(C, H, W))

    # Forward: (B, C, H, W) -> (B, C*H*W)
    flat = jax.block_until_ready(module(x))
    assert flat.shape == (B, C * H * W), flat.shape
    assert flat.dtype == x.dtype
    ref_flat = x.reshape(B, C * H * W)
    np.testing.assert_array_equal(np.asarray(flat), np.asarray(ref_flat))

    # Inverse: (B, C*H*W) -> (B, C, H, W)
    inv_module = module.inverse
    x_rec = jax.block_until_ready(inv_module(flat))
    assert x_rec.shape == (B, C, H, W), x_rec.shape
    np.testing.assert_array_equal(np.asarray(x_rec), np.asarray(x))

    print("KERNEL_OK")
</pallas_src>

<mosaic_0001>
module attributes {stable_mosaic.version = 11 : i64} {
  func.func @_copy_kernel(%arg0: i32, %arg1: memref<2x1024xf32, #tpu.memory_space<vmem>>, %arg2: memref<2x1024xf32, #tpu.memory_space<vmem>>) attributes {dimension_semantics = [#tpu.dimension_semantics<parallel>], iteration_bounds = array<i64: 1>, scalar_prefetch = 0 : i64, scratch_operands = 0 : i64, tpu.core_type = #tpu.core_type<tc>, window_params = [{transform_indices = @transform_0, window_bounds = array<i64: 2, 1024>}, {transform_indices = @transform_1, window_bounds = array<i64: 2, 1024>}]} {
    %c0 = arith.constant 0 : index
    %c0_0 = arith.constant 0 : index
    %0 = vector.load %arg1[%c0, %c0_0] : memref<2x1024xf32, #tpu.memory_space<vmem>>, vector<2x1024xf32>
    %c0_1 = arith.constant 0 : index
    %c0_2 = arith.constant 0 : index
    %1 = vector.load %arg2[%c0_1, %c0_2] : memref<2x1024xf32, #tpu.memory_space<vmem>>, vector<2x1024xf32>
    tpu.vector_store %arg2[%c0_1, %c0_2], %0 {strides = array<i32>} : memref<2x1024xf32, #tpu.memory_space<vmem>>, vector<2x1024xf32>,
    return
  }
  func.func @transform_0(%arg0: i32) -> (i32, i32) {
    %c0_i32 = arith.constant 0 : i32
    %c0_i32_0 = arith.constant 0 : i32
    return %arg0, %c0_i32 : i32, i32
  }
  func.func @transform_1(%arg0: i32) -> (i32, i32) {
    %c0_i32 = arith.constant 0 : i32
    %c0_i32_0 = arith.constant 0 : i32
    return %arg0, %c0_i32 : i32, i32
  }
}

</mosaic_0001>

<bundles_post_ra>
// kernel: tpu_custom_call.1
= control target key start
LH: loop header
LB: loop body
LE: loop exit
PB: predicated region body
PF: predicated region fallthrough
CT: control target
= control target key end

     0   :  { %6 = vsyncpa [#allocation3], 0  ;;  %s104_s0 = inlined_call_operand.hbm [shape: f32[2,1024], index: 0, kind: input, shape index: {}, may-alias: {0,1}]   ;;  %s105_s1 = inlined_call_operand.hbm [shape: f32[2,1024], index: 1, kind: output, shape index: {}, may-alias: {0,1}]  }
   0x1   :  { %7 = vsyncpa [#allocation4], 0  ;;  %s86_s6 = smov [#allocation2]  }
   0x2   :  { %s14_s7 = sshll.u32 %s86_s6, 4  ;;  %s15_s7 = int_to_ptr.vmem [resolvable:$true] %s14_s7 }
   0x3   :  { %s50_s8 = scalar_lea.vmem %s15_s7, 256  ;;  %p55_p1 = scmp.lt.s32.totalorder %s15_s7, %s15_s7 }
   0x4   :  { %p51_p0 = scmp.ne.s32.totalorder %s15_s7, %s50_s8  ;;  %p56_p2 = scmp.lt.s32.totalorder %s50_s8, %s50_s8 }
   0x6   :  { %p57_p3 = por %p56_p2, %p55_p1 }
   0x8   :  { %p58_p4 = pnand %p57_p3, %p51_p0 }
   0xa   :  { %61 = shalt.err (!%p58_p4)
}
   0xb   :  { %17 = dma.hbm_to_vmem [thread:$0]  %s104_s0, 256, %s15_s7, [#allocation3]  }
   0xc   :  { %82 = dma.done.wait [#allocation3], 256  }
   0xd   :  { %83 = vsyncadd [#allocation3], 4294967040  ;;  %s87_s11 = smov [#allocation5]   ;;  %v21_v0 = vld [vmem:[#allocation2] sm:$0xff]  ;;  %v22_v1 = vld [vmem:[#allocation2 + $0x8] sm:$0xff] }
   0xe   :  { %s31_s12 = sshll.u32 %s87_s11, 4  ;;  %23 = vst [vmem:[#allocation5] sm:$0xff] %v21_v0  ;;  %24 = vst [vmem:[#allocation5 + $0x8] sm:$0xff] %v22_v1  ;;  %s32_s12 = int_to_ptr.vmem [resolvable:$true] %s31_s12 }
   0xf   :  { %s62_s13 = scalar_lea.vmem %s32_s12, 256  ;;  %p67_p6 = scmp.lt.s32.totalorder %s32_s12, %s32_s12 }
  0x10   :  { %p63_p5 = scmp.ne.s32.totalorder %s32_s12, %s62_s13  ;;  %p68_p7 = scmp.lt.s32.totalorder %s62_s13, %s62_s13 }
  0x12   :  { %p69_p8 = por %p68_p7, %p67_p6 }
  0x14   :  { %p70_p9 = pnand %p69_p8, %p63_p5 }
  0x16   :  { %73 = shalt.err (!%p70_p9)
}
  0x17   :  { %34 = dma.vmem_to_hbm [thread:$0]  %s32_s12, 256, %s105_s1, [#allocation4]  }
  0x18   :  { %84 = dma.done.wait [#allocation4], 256  }
  0x19   :  { %85 = vsyncadd [#allocation4], 4294967040 }
  0x1a   :  { %38 = vsyncpa [#allocation3], 1 }
  0x1b   :  { %39 = vsyncpa [#allocation4], 1 }

</bundles_post_ra>
